<compile_context>
chip_gen: v7x
topology: tpu7x:2x2x1
jax: 0.10.0
libtpu: 0.0.40
codegen_flags: <defaults>
</compile_context>

<pallas_src>
import jax
import jax.numpy as jnp
from jax.experimental import pallas as pl
from jax.experimental.pallas import tpu as pltpu

_NEG_BIG = -1e30  # finite "-inf" sentinel (avoids inf-inf NaN in the online LSE)


def _round_up(v, m):
    return ((v + m - 1) // m) * m


def _choose_tile_n(tB, D, N_128):
    """Largest lane tile (multiple of 128) whose double-buffered blocks plus
    live (tB, tN) f32 temporaries fit a conservative VMEM budget."""
    budget = 18 * 1024 * 1024
    tn = 128
    while tn < min(N_128, 4096):
        nxt = tn * 2
        z_b = 2 * D * nxt * 2          # double-buffered bf16 particle tile
        lw_b = 2 * tB * nxt * 4        # double-buffered f32 logw tile
        tmp_b = 6 * tB * nxt * 4       # live (tB, tN) f32 elementwise temps
        pmq_b = 2 * 8 * nxt * 4        # (1, tN) f32, sublane-padded
        if z_b + lw_b + tmp_b + pmq_b > budget:
            break
        tn = nxt
    return tn


def _ais_logw_kernel(x_ref, y_ref, zt_ref, pmq_ref, logw_ref, lse_ref, m_sc, s_sc):
    """One (core-split, batch-tile, particle-tile) step of the importance-weight
    pass.  Grid = (core split [parallel], batch tiles [parallel],
    particle tiles [arbitrary/reduction]).  Running max / sum-exp live in VMEM
    scratch (online logsumexp)."""
    n_idx = pl.program_id(2)
    n_last = pl.num_programs(2) - 1

    @pl.when(n_idx == 0)
    def _init():
        m_sc[...] = jnp.full(m_sc.shape, _NEG_BIG, dtype=jnp.float32)
        s_sc[...] = jnp.zeros(s_sc.shape, dtype=jnp.float32)

    x = x_ref[...]            # (tB, D)  bf16 (MXU operand)
    y = y_ref[...]            # (tB, 1)  f32 in {0,1}
    zt = zt_ref[...]          # (D, tN)  bf16, particle axis on lanes
    pmq = pmq_ref[...]        # (1, tN)  f32 (padded cols = _NEG_BIG)

    # ---- logistic-regression log-likelihood, (tB, tN) --------------------
    logits = jnp.dot(x, zt, preferred_element_type=jnp.float32)   # MXU, f32 acc
    sign = 2.0 * y - 1.0                                          # (tB, 1)
    t = sign * logits                                             # (tB, tN)
    e = jnp.exp(-jnp.abs(t))                                      # EUP
    log_lik = jnp.minimum(t, 0.0) - jnp.log1p(e)                  # log sigmoid(t)

    logw = log_lik + pmq                                          # (tB, tN)
    logw_ref[...] = logw

    # ---- online logsumexp over the particle axis --------------------------
    tile_max = jnp.max(logw, axis=-1, keepdims=True)              # (tB, 1)
    m_old = m_sc[...]
    m_new = jnp.maximum(m_old, tile_max)
    tile_sum = jnp.sum(jnp.exp(logw - m_new), axis=-1, keepdims=True)
    s_sc[...] = s_sc[...] * jnp.exp(m_old - m_new) + tile_sum
    m_sc[...] = m_new

    @pl.when(n_idx == n_last)
    def _finalize():
        lse_ref[...] = (m_sc[...] + jnp.log(s_sc[...]))[None]     # (1, tB, 1)


def logistic_regression_ais_forward(x, y, q_mu, q_log_sigma, n_particles, key):
    """Mirrors LogisticRegressionAISModel.forward.

    x: (B, D) float, y: (B,) float in {0,1}.
    Returns sampled particles, per-particle log weights and the per-row
    log-marginal (logsumexp) estimate.
    """
    B, D = x.shape
    N = int(n_particles)

    # ---- tile sizes --------------------------------------------------------
    B_pad = _round_up(B, 8)
    tB = min(B_pad, 128)
    B_pad = _round_up(B_pad, tB)
    nb = B_pad // tB

    N_128 = _round_up(N, 128)
    tN = min(_choose_tile_n(tB, D, N_128), N_128)
    N_pad = _round_up(N, tN)
    nn = N_pad // tN

    # Core split of the particle axis: only when the batch axis cannot feed
    # both TensorCores (v7x) and the split is exact.
    nc = 2 if (nb == 1 and nn >= 2 and nn % 2 == 0) else 1
    nn_c = nn // nc

    # ---- sample particles in (D, N) lane-major layout (no transpose) -------
    mu_f = q_mu.astype(jnp.float32)
    ls_f = q_log_sigma.astype(jnp.float32)
    eps = jax.random.normal(key, (D, N), dtype=jnp.float32)
    z_t = mu_f[:, None] + jnp.exp(ls_f)[:, None] * eps             # (D, N) f32

    # Hoisted prior/proposal ratio: log N(z;0,I) - log N(z;mu,sigma)
    # (the 0.5*D*log(2pi) terms cancel; (z - mu)/sigma == eps exactly).
    pmq = (-0.5 * jnp.sum(z_t * z_t - eps * eps, axis=0, keepdims=True)
           + jnp.sum(ls_f))                                        # (1, N) f32

    # ---- pad + cast once in the wrapper ------------------------------------
    z_bf = z_t.astype(jnp.bfloat16)
    if N_pad != N:
        z_bf = jnp.pad(z_bf, ((0, 0), (0, N_pad - N)))
        pmq = jnp.pad(pmq, ((0, 0), (0, N_pad - N)), constant_values=_NEG_BIG)

    x_f = x.astype(jnp.float32)
    y_f = y.astype(jnp.float32).reshape(-1)
    if B_pad != B:
        x_f = jnp.pad(x_f, ((0, B_pad - B), (0, 0)))
        y_f = jnp.pad(y_f, (0, B_pad - B))
    x_bf = x_f.astype(jnp.bfloat16)        # MXU operand (halves x DMA bytes)
    y2 = y_f.reshape(B_pad, 1)

    logw_p, lse_p = pl.pallas_call(
        _ais_logw_kernel,
        out_shape=(
            jax.ShapeDtypeStruct((B_pad, N_pad), jnp.float32),
            jax.ShapeDtypeStruct((nc, B_pad, 1), jnp.float32),
        ),
        grid_spec=pltpu.PrefetchScalarGridSpec(
            num_scalar_prefetch=0,
            grid=(nc, nb, nn_c),
            in_specs=[
                pl.BlockSpec((tB, D), lambda c, b, n: (b, 0)),    # x (resident)
                pl.BlockSpec((tB, 1), lambda c, b, n: (b, 0)),    # y (resident)
                pl.BlockSpec((D, tN), lambda c, b, n: (0, c * nn_c + n)),  # z bf16
                pl.BlockSpec((1, tN), lambda c, b, n: (0, c * nn_c + n)),  # pmq
            ],
            out_specs=(
                pl.BlockSpec((tB, tN), lambda c, b, n: (b, c * nn_c + n)),  # logw
                pl.BlockSpec((1, tB, 1), lambda c, b, n: (c, b, 0)),        # partial LSE
            ),
            scratch_shapes=[
                pltpu.VMEM((tB, 1), jnp.float32),                 # running max
                pltpu.VMEM((tB, 1), jnp.float32),                 # running sum-exp
            ],
        ),
        compiler_params=pltpu.CompilerParams(
            dimension_semantics=("parallel", "parallel", "arbitrary"),
            vmem_limit_bytes=32 * 1024 * 1024,
        ),
    )(x_bf, y2, z_bf, pmq)

    logw = logw_p[:B, :N]

    # Combine the per-core partial logsumexps (nc is 1 or 2) and subtract log N.
    lse = lse_p[:, :B, 0]                                          # (nc, B)
    m = jnp.max(lse, axis=0)
    logz = m + jnp.log(jnp.sum(jnp.exp(lse - m), axis=0)) - jnp.log(jnp.float32(N))

    # Output formatting only (off the kernel path): (1, N, D) like q.sample((1, N)).
    z = jnp.swapaxes(z_t, 0, 1)[None, :, :]

    return {
        "z": z,                       # (1, N, D)
        "logw": logw,                 # (B, N)
        "log_normalizer": logz,       # (B,)  logsumexp_n(logw) - log N per row
    }


if __name__ == "__main__":
    B, N, D = 8, 128, 32   # batch_size, n_particles, zdim

    key = jax.random.PRNGKey(0)
    k_x, k_y, k_mu, k_ls, k_z = jax.random.split(key, 5)

    x = jax.random.normal(k_x, (B, D), dtype=jnp.float32)
    y = (jax.random.uniform(k_y, (B,)) > 0.5).astype(jnp.float32)
    q_mu = 0.1 * jax.random.normal(k_mu, (D,), dtype=jnp.float32)
    q_log_sigma = -0.5 + 0.05 * jax.random.normal(k_ls, (D,), dtype=jnp.float32)

    out = logistic_regression_ais_forward(x, y, q_mu, q_log_sigma, N, k_z)
    jax.block_until_ready(out)

    assert out["logw"].shape == (B, N)
    assert out["log_normalizer"].shape == (B,)
    assert bool(jnp.all(jnp.isfinite(out["logw"])))
    assert bool(jnp.all(jnp.isfinite(out["log_normalizer"])))

    # Pure-JAX reference (bf16-consistent on the matmul operands).
    z_t = jnp.swapaxes(out["z"][0], 0, 1)                           # (D, N)
    xb = x.astype(jnp.bfloat16).astype(jnp.float32)
    zb = z_t.astype(jnp.bfloat16).astype(jnp.float32)
    logits = xb @ zb
    sgn = (2.0 * y - 1.0)[:, None]
    log_lik = -jnp.logaddexp(0.0, -(sgn * logits))
    u = (z_t - q_mu[:, None]) * jnp.exp(-q_log_sigma)[:, None]
    pmq_ref = -0.5 * jnp.sum(z_t * z_t - u * u, axis=0) + jnp.sum(q_log_sigma)
    logw_ref = log_lik + pmq_ref[None, :]
    m = jnp.max(logw_ref, axis=1, keepdims=True)
    logz_ref = (m[:, 0] + jnp.log(jnp.sum(jnp.exp(logw_ref - m), axis=1))
                - jnp.log(jnp.float32(N)))
    assert bool(jnp.allclose(out["logw"], logw_ref, atol=5e-2, rtol=0.0))
    assert bool(jnp.allclose(out["log_normalizer"], logz_ref, atol=5e-2, rtol=0.0))

    print("KERNEL_OK")
</pallas_src>

<mosaic_0001>
module attributes {stable_mosaic.version = 11 : i64} {
  func.func @_ais_logw_kernel(%arg0: i32, %arg1: i32, %arg2: i32, %arg3: memref<8x32xbf16, #tpu.memory_space<vmem>>, %arg4: memref<8x1xf32, #tpu.memory_space<vmem>>, %arg5: memref<32x128xbf16, #tpu.memory_space<vmem>>, %arg6: memref<1x128xf32, #tpu.memory_space<vmem>>, %arg7: memref<8x128xf32, #tpu.memory_space<vmem>>, %arg8: memref<1x8x1xf32, #tpu.memory_space<vmem>>, %arg9: memref<8x1xf32, #tpu.memory_space<vmem>>, %arg10: memref<8x1xf32, #tpu.memory_space<vmem>>) attributes {dimension_semantics = [#tpu.dimension_semantics<parallel>, #tpu.dimension_semantics<parallel>, #tpu.dimension_semantics<arbitrary>], iteration_bounds = array<i64: 1, 1, 1>, scalar_prefetch = 0 : i64, scratch_operands = 2 : i64, tpu.core_type = #tpu.core_type<tc>, window_params = [{transform_indices = @transform_0, window_bounds = array<i64: 8, 32>}, {transform_indices = @transform_1, window_bounds = array<i64: 8, 1>}, {transform_indices = @transform_2, window_bounds = array<i64: 32, 128>}, {transform_indices = @transform_3, window_bounds = array<i64: 1, 128>}, {transform_indices = @transform_4, window_bounds = array<i64: 8, 128>}, {transform_indices = @transform_5, window_bounds = array<i64: 1, 8, 1>}]} {
    %c0_i32 = arith.constant 0 : i32
    %0 = arith.cmpi eq, %arg2, %c0_i32 : i32
    %1 = arith.extui %0 : i1 to i32
    %c0_i32_0 = arith.constant 0 : i32
    %2 = arith.cmpi ne, %1, %c0_i32_0 : i32
    scf.if %2 {
      %cst_26 = arith.constant -1.000000e+30 : f32
      %44 = vector.broadcast %cst_26 : f32 to vector<8x1xf32>
      %c0_27 = arith.constant 0 : index
      %c0_28 = arith.constant 0 : index
      %45 = vector.load %arg9[%c0_27, %c0_28] : memref<8x1xf32, #tpu.memory_space<vmem>>, vector<8x1xf32>
      tpu.vector_store %arg9[%c0_27, %c0_28], %44 {strides = array<i32>} : memref<8x1xf32, #tpu.memory_space<vmem>>, vector<8x1xf32>,
      %cst_29 = arith.constant 0.000000e+00 : f32
      %46 = vector.broadcast %cst_29 : f32 to vector<8x1xf32>
      %c0_30 = arith.constant 0 : index
      %c0_31 = arith.constant 0 : index
      %47 = vector.load %arg10[%c0_30, %c0_31] : memref<8x1xf32, #tpu.memory_space<vmem>>, vector<8x1xf32>
      tpu.vector_store %arg10[%c0_30, %c0_31], %46 {strides = array<i32>} : memref<8x1xf32, #tpu.memory_space<vmem>>, vector<8x1xf32>,
    } else {
    }
    %c0 = arith.constant 0 : index
    %c0_1 = arith.constant 0 : index
    %3 = vector.load %arg3[%c0, %c0_1] : memref<8x32xbf16, #tpu.memory_space<vmem>>, vector<8x32xbf16>
    %c0_2 = arith.constant 0 : index
    %c0_3 = arith.constant 0 : index
    %4 = vector.load %arg4[%c0_2, %c0_3] : memref<8x1xf32, #tpu.memory_space<vmem>>, vector<8x1xf32>
    %c0_4 = arith.constant 0 : index
    %c0_5 = arith.constant 0 : index
    %5 = vector.load %arg5[%c0_4, %c0_5] : memref<32x128xbf16, #tpu.memory_space<vmem>>, vector<32x128xbf16>
    %c0_6 = arith.constant 0 : index
    %c0_7 = arith.constant 0 : index
    %6 = vector.load %arg6[%c0_6, %c0_7] : memref<1x128xf32, #tpu.memory_space<vmem>>, vector<1x128xf32>
    %cst = arith.constant dense<0.000000e+00> : vector<8x128xf32>
    %7 = tpu.matmul %3, %5, %cst {dimension_numbers = #tpu.dot_dimension_numbers<[1], [0], [0], [1], [0, 0, 1, 1], [], []>} : vector<8x32xbf16>, vector<32x128xbf16>, vector<8x128xf32> -> vector<8x128xf32>
    %cst_8 = arith.constant 2.000000e+00 : f32
    %8 = vector.broadcast %cst_8 : f32 to vector<8x1xf32>
    %9 = arith.mulf %8, %4 : vector<8x1xf32>
    %cst_9 = arith.constant 1.000000e+00 : f32
    %10 = vector.broadcast %cst_9 : f32 to vector<8x1xf32>
    %11 = arith.subf %9, %10 : vector<8x1xf32>
    %12 = vector.broadcast %11 : vector<8x1xf32> to vector<8x128xf32>
    %13 = arith.mulf %12, %7 : vector<8x128xf32>
    %14 = math.absf %13 : vector<8x128xf32>
    %cst_10 = arith.constant 0.000000e+00 : f32
    %15 = vector.broadcast %cst_10 : f32 to vector<8x128xf32>
    %16 = arith.subf %15, %14 : vector<8x128xf32>
    %17 = math.exp %16 : vector<8x128xf32>
    %cst_11 = arith.constant 0.000000e+00 : f32
    %18 = vector.broadcast %cst_11 : f32 to vector<8x128xf32>
    %19 = arith.minimumf %13, %18 : vector<8x128xf32>
    %20 = math.log1p %17 : vector<8x128xf32>
    %21 = arith.subf %19, %20 : vector<8x128xf32>
    %22 = vector.broadcast %6 : vector<1x128xf32> to vector<8x128xf32>
    %23 = arith.addf %21, %22 : vector<8x128xf32>
    %c0_12 = arith.constant 0 : index
    %c0_13 = arith.constant 0 : index
    %24 = vector.load %arg7[%c0_12, %c0_13] : memref<8x128xf32, #tpu.memory_space<vmem>>, vector<8x128xf32>
    tpu.vector_store %arg7[%c0_12, %c0_13], %23 {strides = array<i32>} : memref<8x128xf32, #tpu.memory_space<vmem>>, vector<8x128xf32>,
    %cst_14 = arith.constant dense<0xFF800000> : vector<8xf32>
    %25 = vector.multi_reduction <maximumf>, %23, %cst_14 [1] : vector<8x128xf32> to vector<8xf32>
    %26 = vector.shape_cast %25 : vector<8xf32> to vector<8x1xf32>
    %c0_15 = arith.constant 0 : index
    %c0_16 = arith.constant 0 : index
    %27 = vector.load %arg9[%c0_15, %c0_16] : memref<8x1xf32, #tpu.memory_space<vmem>>, vector<8x1xf32>
    %28 = arith.maximumf %27, %26 : vector<8x1xf32>
    %29 = vector.broadcast %28 : vector<8x1xf32> to vector<8x128xf32>
    %30 = arith.subf %23, %29 : vector<8x128xf32>
    %31 = math.exp %30 : vector<8x128xf32>
    %cst_17 = arith.constant dense<0.000000e+00> : vector<8xf32>
    %32 = vector.multi_reduction <add>, %31, %cst_17 [1] : vector<8x128xf32> to vector<8xf32>
    %33 = vector.shape_cast %32 : vector<8xf32> to vector<8x1xf32>
    %c0_18 = arith.constant 0 : index
    %c0_19 = arith.constant 0 : index
    %34 = vector.load %arg10[%c0_18, %c0_19] : memref<8x1xf32, #tpu.memory_space<vmem>>, vector<8x1xf32>
    %35 = arith.subf %27, %28 : vector<8x1xf32>
    %36 = math.exp %35 : vector<8x1xf32>
    %37 = arith.mulf %34, %36 : vector<8x1xf32>
    %38 = arith.addf %37, %33 : vector<8x1xf32>
    %c0_20 = arith.constant 0 : index
    %c0_21 = arith.constant 0 : index
    %39 = vector.load %arg10[%c0_20, %c0_21] : memref<8x1xf32, #tpu.memory_space<vmem>>, vector<8x1xf32>
    tpu.vector_store %arg10[%c0_20, %c0_21], %38 {strides = array<i32>} : memref<8x1xf32, #tpu.memory_space<vmem>>, vector<8x1xf32>,
    %c0_22 = arith.constant 0 : index
    %c0_23 = arith.constant 0 : index
    %40 = vector.load %arg9[%c0_22, %c0_23] : memref<8x1xf32, #tpu.memory_space<vmem>>, vector<8x1xf32>
    tpu.vector_store %arg9[%c0_22, %c0_23], %28 {strides = array<i32>} : memref<8x1xf32, #tpu.memory_space<vmem>>, vector<8x1xf32>,
    %c0_i32_24 = arith.constant 0 : i32
    %41 = arith.cmpi eq, %arg2, %c0_i32_24 : i32
    %42 = arith.extui %41 : i1 to i32
    %c0_i32_25 = arith.constant 0 : i32
    %43 = arith.cmpi ne, %42, %c0_i32_25 : i32
    scf.if %43 {
      %c0_26 = arith.constant 0 : index
      %c0_27 = arith.constant 0 : index
      %44 = vector.load %arg9[%c0_26, %c0_27] : memref<8x1xf32, #tpu.memory_space<vmem>>, vector<8x1xf32>
      %c0_28 = arith.constant 0 : index
      %c0_29 = arith.constant 0 : index
      %45 = vector.load %arg10[%c0_28, %c0_29] : memref<8x1xf32, #tpu.memory_space<vmem>>, vector<8x1xf32>
      %46 = math.log %45 : vector<8x1xf32>
      %47 = arith.addf %44, %46 : vector<8x1xf32>
      %48 = vector.shape_cast %47 : vector<8x1xf32> to vector<1x8x1xf32>
      %c0_30 = arith.constant 0 : index
      %c0_31 = arith.constant 0 : index
      %c0_32 = arith.constant 0 : index
      %49 = vector.load %arg8[%c0_30, %c0_31, %c0_32] : memref<1x8x1xf32, #tpu.memory_space<vmem>>, vector<1x8x1xf32>
      tpu.vector_store %arg8[%c0_30, %c0_31, %c0_32], %48 {strides = array<i32>} : memref<1x8x1xf32, #tpu.memory_space<vmem>>, vector<1x8x1xf32>,
    } else {
    }
    return
  }
  func.func @transform_0(%arg0: i32, %arg1: i32, %arg2: i32) -> (i32, i32) {
    %c0_i32 = arith.constant 0 : i32
    %c0_i32_0 = arith.constant 0 : i32
    return %arg1, %c0_i32 : i32, i32
  }
  func.func @transform_1(%arg0: i32, %arg1: i32, %arg2: i32) -> (i32, i32) {
    %c0_i32 = arith.constant 0 : i32
    %c0_i32_0 = arith.constant 0 : i32
    return %arg1, %c0_i32 : i32, i32
  }
  func.func @transform_2(%arg0: i32, %arg1: i32, %arg2: i32) -> (i32, i32) {
    %c1_i32 = arith.constant 1 : i32
    %0 = arith.muli %arg0, %c1_i32 : i32
    %1 = arith.addi %0, %arg2 : i32
    %c0_i32 = arith.constant 0 : i32
    %c0_i32_0 = arith.constant 0 : i32
    return %c0_i32, %1 : i32, i32
  }
  func.func @transform_3(%arg0: i32, %arg1: i32, %arg2: i32) -> (i32, i32) {
    %c1_i32 = arith.constant 1 : i32
    %0 = arith.muli %arg0, %c1_i32 : i32
    %1 = arith.addi %0, %arg2 : i32
    %c0_i32 = arith.constant 0 : i32
    %c0_i32_0 = arith.constant 0 : i32
    return %c0_i32, %1 : i32, i32
  }
  func.func @transform_4(%arg0: i32, %arg1: i32, %arg2: i32) -> (i32, i32) {
    %c1_i32 = arith.constant 1 : i32
    %0 = arith.muli %arg0, %c1_i32 : i32
    %1 = arith.addi %0, %arg2 : i32
    %c0_i32 = arith.constant 0 : i32
    return %arg1, %1 : i32, i32
  }
  func.func @transform_5(%arg0: i32, %arg1: i32, %arg2: i32) -> (i32, i32, i32) {
    %c0_i32 = arith.constant 0 : i32
    %c0_i32_0 = arith.constant 0 : i32
    return %arg0, %arg1, %c0_i32 : i32, i32, i32
  }
}

</mosaic_0001>

<bundles_post_ra>
// kernel: tpu_custom_call.1
= control target key start
LH: loop header
LB: loop body
LE: loop exit
PB: predicated region body
PF: predicated region fallthrough
CT: control target
= control target key end

     0   :  { %11 = vsyncpa [#allocation5], 0  ;;  %s393_s0 = inlined_call_operand.hbm [shape: bf16[8,32], index: 0, kind: input, shape index: {}]   ;;  %s394_s1 = inlined_call_operand.vmem [shape: f32[8,1], index: 1, kind: input, shape index: {}]   ;;  %s395_s2 = inlined_call_operand.vmem [shape: bf16[32,128], index: 2, kind: input, shape index: {}]   ;;  %s396_s3 = inlined_call_operand.vmem [shape: f32[1,128], index: 3, kind: input, shape index: {}]   ;;  %s397_s4 = inlined_call_operand.hbm [shape: f32[8,128], index: 4, kind: output, shape index: {0}]   ;;  %s398_s5 = inlined_call_operand.vmem [shape: f32[1,8,1], index: 5, kind: output, shape index: {1}]  }
   0x1   :  { %12 = vsyncpa [#allocation6], 0  ;;  %s313_s18 = smov [#allocation4]   ;;  %s265_s22 = scalar_lea.hbm %s393_s0, 64 }
   0x2   :  { %s19_s19 = sshll.u32 %s313_s18, 4  ;;  %p266_p0 = scmp.ne.s32.totalorder %s393_s0, %s265_s22  ;;  %s20_s19 = int_to_ptr.vmem [resolvable:$true] %s19_s19 }
   0x3   :  { %p269_p1 = scmp.lt.u32.totalorder %s265_s22, %s393_s0 }
   0x5   :  { %p271_p2 = pnand %p269_p1, %p266_p0 }
   0x7   :  { %274 = shalt.err (!%p271_p2)
}
   0x8   :  { %s275_s27 = scalar_lea.vmem %s20_s19, 64  ;;  %p280_p4 = scmp.lt.s32.totalorder %s20_s19, %s20_s19 }
   0x9   :  { %p276_p3 = scmp.ne.s32.totalorder %s20_s19, %s275_s27  ;;  %p281_p5 = scmp.lt.s32.totalorder %s275_s27, %s275_s27 }
   0xb   :  { %p282_p6 = por %p281_p5, %p280_p4 }
   0xd   :  { %p283_p7 = pnand %p282_p6, %p276_p3 }
   0xf   :  { %286 = shalt.err (!%p283_p7)
}
  0x10   :  { %22 = dma.hbm_to_vmem [thread:$0]  %s393_s0, 64, %s20_s19, [#allocation5]  }
  0x11   :  { %309 = dma.done.wait [#allocation5], 64  }
  0x12   :  { %310 = vsyncadd [#allocation5], 4294967232  ;;  %vm69_vm0 = vcmask 7168   ;;  %v314_v0 = vmov 0.0   ;;  %vm315_vm1 = vmmov 0   ;;  %v316_v1 = vmov 0  }
  0x13   :  { %71 = vst.msk [vmem:[#allocation3] sm:$0xff] %vm69_vm0, %v314_v0  ;;  %237 = vmatprep.subr.bf16.mxu0 %v314_v0  ;;  %241 = vmatprep.mubr.msk.bf16.mxu0 %vm315_vm1, %v314_v0  ;;  %v253_v2 = vld [vmem:[%s395_s2] sm:$0xff]   ;;  %v254_v3 = vld [vmem:[%s395_s2 + $0x8] sm:$0xff]   ;;  %v72_v7 = vld [vmem:[#allocation4] sm:$0xf]  ;;  %vm91_vm2 = vcmask 261120  }
  0x14   :  { %251 = vset.pattern.permute.xlu0 %v316_v1  ;;  %252 = vset.pattern.permute.xlu1 %v316_v1  ;;  %v73_v4 = vld [vmem:[%s394_s1] sm:$0xff]  ;;  %v317_v8 = vmov -1e+30   ;;  %s318_s10 = smov [#allocation7]  }
  0x15   :  { %238 = vmatpush3.bf16.msra.mxu0 %v253_v2  ;;  %v135_v5 = vmul.f32 2.0, %v73_v4  ;;  %70 = vst.msk [vmem:[#allocation2] sm:$0xff] %vm69_vm0, %v317_v8  ;;  %v233_v28 = vld [vmem:[%s396_s3] ss:$0 sm:$0xff]  ;;  %s207_s11 = sshll.u32 %s318_s10, 4  ;;  %s208_s11 = int_to_ptr.vmem [resolvable:$true] %s207_s11 }
  0x16   :  { %239 = vmatprep.subr.bf16.mxu0 %v314_v0  ;;  %s287_s3 = scalar_lea.vmem %s208_s11, 128  ;;  %p292_p9 = scmp.lt.s32.totalorder %s208_s11, %s208_s11 }
  0x17   :  { %v232_v6 = vadd.f32 -1.0, %v135_v5  ;;  %p288_p8 = scmp.ne.s32.totalorder %s208_s11, %s287_s3  ;;  %p293_p10 = scmp.lt.s32.totalorder %s287_s3, %s287_s3 }
  0x19   :  { %240 = vmatpush3.bf16.msra.mxu0 %v254_v3  ;;  %139 = vperm.xlu0 %251, %v232_v6   ;;  %p294_p11 = por %p293_p10, %p292_p9 }
  0x1b   :  { %p295_p12 = pnand %p294_p11, %p288_p8 }
  0x1c   :  { %242 = vmatmul.mubr.msk.bf16.vlgmr.msra.gmra.mrb[0].mxu0 %vm91_vm2, %v72_v7  ;;  %v168_v31 = vld [vmem:[#allocation2] sm:$0xff] }
  0x98   :  { %v140_v9 = vpop.permute.xlu0 %139 }
  0xef   :  { %v129_v10 = vpop.f32.mrb[0].mxu0 }
  0xf0   :  { %v142_v11 = vmul.f32 %v140_v9, %v129_v10  ;;  %v243_v12 = vpop.f32.mrb[1].mxu0 }
  0xf1   :  { %v132_v13 = vpop.f32.mrb[2].mxu0 }
  0xf2   :  { %v143_v14 = vand.u32 2147483647, %v142_v11  ;;  %v244_v15 = vpop.f32.mrb[3].mxu0  ;;  %v147_v26 = vmin.f32 %v142_v11, 0.0 }
  0xf4   :  { %v144_v16 = vsub.f32 0.0, %v143_v14 }
  0xf6   :  { %v145_v17 = vmul.f32 1.442695, %v144_v16 }
  0xf8   :  { %255 = vpow2.f32 %v145_v17 }
 0x102   :  { %v256_v18 = vpop.eup %255 }
 0x103   :  { %v148_v19 = vadd.f32 1.0, %v256_v18  ;;  %v151_v20 = vmul.f32 -0.5, %v256_v18  ;;  %v154_v22 = vand.u32 2147483647, %v256_v18 }
 0x105   :  { %257 = vlog2.f32 %v148_v19  ;;  %v152_v21 = vadd.f32 1.0, %v151_v20  ;;  %vm155_vm3 = vcmp.lt.f32.partialorder %v154_v22, 0.0004427343 }
 0x107   :  { %v153_v25 = vmul.f32 %v256_v18, %v152_v21 }
 0x10f   :  { %v258_v23 = vpop.eup %257 }
 0x110   :  { %v150_v24 = vmul.f32 0.6931472, %v258_v23 }
 0x112   :  { %v156_v27 = vsel %vm155_vm3, %v153_v25, %v150_v24 }
 0x113   :  { %v157_v29 = vsub.f32 %v147_v26, %v156_v27 }
 0x115   :  { %v164_v30 = vadd.f32 %v233_v28, %v157_v29 }
 0x117   :  { %166 = vmax.xlane.f32.xlu0 %v164_v30  ;;  %165 = vst [vmem:[#allocation7] sm:$0xff] %v164_v30 }
 0x1a4   :  { %v167_v32 = vpop.xlane.xlu0 %166 }
 0x1a5   :  { %v169_v33 = vmax.f32 %v168_v31, %v167_v32 }
 0x1a7   :  { %v181_v34 = vsub.f32 %v168_v31, %v169_v33  ;;  %188 = vst.msk [vmem:[#allocation2] sm:$0xff] %vm69_vm0, %v169_v33  ;;  %172 = vperm.xlu1 %252, %v169_v33  }
 0x226   :  { %v173_v35 = vpop.permute.xlu1 %172 }
 0x227   :  { %v175_v36 = vsub.f32 %v164_v30, %v173_v35 }
 0x229   :  { %v176_v37 = vmul.f32 1.442695, %v175_v36 }
 0x22b   :  { %259 = vpow2.f32 %v176_v37 }
 0x235   :  { %v260_v38 = vpop.eup %259 }
 0x236   :  { %178 = vadd.xlane.f32.xlu1 %v260_v38 }
 0x237   :  { %298 = shalt.err (!%p295_p12)
}
 0x238   :  { %s299_s14 = scalar_lea.hbm %s397_s4, 128 }
 0x239   :  { %p300_p13 = scmp.ne.s32.totalorder %s397_s4, %s299_s14  ;;  %p303_p0 = scmp.lt.u32.totalorder %s299_s14, %s397_s4 }
 0x23b   :  { %p305_p1 = pnand %p303_p0, %p300_p13 }
 0x23d   :  { %308 = shalt.err (!%p305_p1)
}
 0x23e   :  { %210 = dma.vmem_to_hbm [thread:$0]  %s208_s11, 128, %s397_s4, [#allocation6]   ;;  %v182_v39 = vmul.f32 1.442695, %v181_v34  ;;  %v180_v41 = vld [vmem:[#allocation3] sm:$0xff]  ;;  %v192_v48 = vld [vmem:[#allocation2] sm:$0xff] }
 0x240   :  { %261 = vpow2.f32 %v182_v39 }
 0x24a   :  { %v262_v40 = vpop.eup %261 }
 0x24b   :  { %v184_v42 = vmul.f32 %v262_v40, %v180_v41 }
 0x2c3   :  { %v179_v43 = vpop.xlane.xlu1 %178 }
 0x2c4   :  { %v185_v44 = vadd.f32 %v184_v42, %v179_v43 }
 0x2c6   :  { %187 = vst.msk [vmem:[#allocation3] sm:$0xff] %vm69_vm0, %v185_v44 }
 0x2cd   :  { %v193_v45 = vld [vmem:[#allocation3] sm:$0xff] }
 0x2ce   :  { %263 = vlog2.f32 %v193_v45 }
 0x2d8   :  { %v264_v46 = vpop.eup %263 }
 0x2d9   :  { %v195_v47 = vmul.f32 0.6931472, %v264_v46 }
 0x2db   :  { %v196_v49 = vadd.f32 %v195_v47, %v192_v48 }
 0x2dd   :  { %197 = vst.msk [vmem:[%s398_s5] sm:$0xff] %vm69_vm0, %v196_v49 }
 0x2de   :  { %311 = dma.done.wait [#allocation6], 128  }
 0x2df   :  { %312 = vsyncadd [#allocation6], 4294967168 }
 0x2e0   :  { %218 = vsyncpa [#allocation5], 1 }
 0x2e1   :  { %219 = vsyncpa [#allocation6], 1 }

</bundles_post_ra>
